<compile_context>
chip_gen: v7x
topology: tpu7x:2x2x1
jax: 0.10.0
libtpu: 0.0.40
codegen_flags: <defaults>
</compile_context>

<pallas_src>
import jax
import jax.numpy as jnp
from jax import lax
from jax.experimental import pallas as pl
from jax.experimental.pallas import tpu as pltpu

_LANE = 128
_SUB = 8


def _ceil_to(x, m):
    return -(-x // m) * m


def _num_tensorcores():
    """TensorCores per device (2 on v7x-style chips, 1 on v5e/v6e); safe fallback = 1."""
    try:
        info = pltpu.get_tpu_info()
        for name in ("num_cores", "core_count", "num_tensorcores",
                     "tensorcores_per_chip", "num_tensor_cores"):
            v = getattr(info, name, None)
            if v:
                return max(1, int(v))
    except Exception:
        pass
    try:
        if "v7" in jax.devices()[0].device_kind.lower():
            return 2
    except Exception:
        pass
    return 1


def _vmem_capacity_bytes():
    try:
        v = getattr(pltpu.get_tpu_info(), "vmem_capacity_bytes", None)
        if v:
            return int(v)
    except Exception:
        pass
    return 128 * 1024 * 1024


# --------------------------------------------------------------------------------------
# static tiling plan (flat rows r = a1*A0 + a0, tiled along the lane axis)
# --------------------------------------------------------------------------------------
def _plan(A0, A1, S, *, max_tile_rows=None, num_cores=None):
    F = 2 * S + 4
    FP = _ceil_to(F + 1, _SUB)            # feature rows + fused return row, sublane padded
    rows = A0 * A1

    vmem_cap = _vmem_capacity_bytes()
    budget = min(24 * 1024 * 1024, max(8 * 1024 * 1024, vmem_cap // 4))
    # per-row VMEM bytes: double-buffered inputs (obs, [t,valid], ret; sublane padded)
    # plus the feature-major aug scratch.
    per_row = 4 * (2 * (_ceil_to(S, _SUB) + 2 * _SUB) + FP)
    cap = max(1024, (budget // per_row) // 1024 * 1024)
    if max_tile_rows is not None:
        cap = max(_LANE, _ceil_to(min(cap, int(max_tile_rows)), _LANE))

    rows_lane = _ceil_to(rows, _LANE)
    if rows_lane <= cap:
        TR, nb_total = rows_lane, 1
    else:
        TR = cap
        nb_total = -(-rows_lane // TR)

    ncores = _num_tensorcores() if num_cores is None else max(1, int(num_cores))
    ncores = ncores if (ncores > 1 and nb_total >= ncores) else 1
    nbc = -(-nb_total // ncores)
    rows_pad = ncores * nbc * TR

    vmem_need = (2 * TR * 4 * (_ceil_to(S, _SUB) + 2 * _SUB)      # double-buffered inputs
                 + FP * TR * 4                                     # aug scratch
                 + 4 * FP * FP * 4)                                # accumulator blocks
    vmem_limit = int(min(max(vmem_cap // 2, 16 * 1024 * 1024),
                         max(16 * 1024 * 1024, 2 * vmem_need)))

    return dict(A0=A0, A1=A1, S=S, F=F, FP=FP, rows=rows, rows_pad=rows_pad,
                TR=TR, ncores=ncores, nbc=nbc, vmem_limit=vmem_limit)


# --------------------------------------------------------------------------------------
# Gram kernel:  G = [X | y] [X | y]^T   (feature-major; X^T X and X^T y in one MXU matmul)
# --------------------------------------------------------------------------------------
def _gram(obs_fm, tv_fm, ret_fm, plan):
    S, FP, TR = plan["S"], plan["FP"], plan["TR"]
    ncores, nbc = plan["ncores"], plan["nbc"]

    def kernel(obs_ref, tv_ref, ret_ref, g_ref, aug_ref):
        j = pl.program_id(1)                           # reduction over row blocks

        @pl.when(j == 0)
        def _init():
            g_ref[...] = jnp.zeros_like(g_ref)
            aug_ref[...] = jnp.zeros_like(aug_ref)     # zero sublane-padding rows once/sweep

        o = obs_ref[...]                               # (S, TR) lane-dense
        tv = tv_ref[...]                               # (2, TR): [t, valid]
        t = tv[0:1, :]
        # lane-dense slab stores build the augmented feature block, feature-major
        aug_ref[0:S, :] = o
        aug_ref[S:2 * S, :] = o * o
        aug_ref[2 * S + 0:2 * S + 1, :] = t
        aug_ref[2 * S + 1:2 * S + 2, :] = t * t
        aug_ref[2 * S + 2:2 * S + 3, :] = t * t * t
        aug_ref[2 * S + 3:2 * S + 4, :] = tv[1:2, :]    # "ones" column (0 on padded rows)
        aug_ref[2 * S + 4:2 * S + 5, :] = ret_ref[...]  # fused return column -> X^T y

        aug = aug_ref[...]
        g_ref[...] += lax.dot_general(aug, aug, (((1,), (1,)), ((), ())),
                                      preferred_element_type=jnp.float32)

    rows_per_core = nbc * TR
    g = pl.pallas_call(
        kernel,
        out_shape=jax.ShapeDtypeStruct((ncores, FP, FP), jnp.float32),
        grid_spec=pltpu.PrefetchScalarGridSpec(
            num_scalar_prefetch=0,
            grid=(ncores, nbc),
            in_specs=[pl.BlockSpec((S, TR), lambda c, j: (0, c * nbc + j)),
                      pl.BlockSpec((2, TR), lambda c, j: (0, c * nbc + j)),
                      pl.BlockSpec((1, TR), lambda c, j: (0, c * nbc + j))],
            out_specs=pl.BlockSpec((None, FP, FP), lambda c, j: (c, 0, 0)),
            scratch_shapes=[pltpu.VMEM((FP, TR), jnp.float32)]),
        compiler_params=pltpu.CompilerParams(
            dimension_semantics=("parallel", "arbitrary"),
            vmem_limit_bytes=plan["vmem_limit"]),
        cost_estimate=pl.CostEstimate(
            flops=2 * ncores * rows_per_core * FP * FP,
            transcendentals=0,
            bytes_accessed=4 * (ncores * rows_per_core * (S + 3) + ncores * FP * FP)),
    )(obs_fm, tv_fm, ret_fm)
    return jnp.sum(g, axis=0)              # (FP, FP): [:F,:F] = X^T X, [:F, F] = X^T y


# --------------------------------------------------------------------------------------
# Value kernel: observation part of X @ w, feature-major, lane-dense output
# --------------------------------------------------------------------------------------
def _values(obs_fm, w_lin, w_sq, plan):
    S, TR, rows_pad = plan["S"], plan["TR"], plan["rows_pad"]
    nb = rows_pad // TR

    def kernel(obs_ref, wl_ref, ws_ref, val_ref):
        o = obs_ref[...]                                           # (S, TR) lane-dense
        val_ref[...] = jnp.sum(o * (wl_ref[...] + o * ws_ref[...]),
                               axis=0, keepdims=True)              # (1, TR)

    return pl.pallas_call(
        kernel,
        out_shape=jax.ShapeDtypeStruct((1, rows_pad), jnp.float32),
        grid_spec=pltpu.PrefetchScalarGridSpec(
            num_scalar_prefetch=0,
            grid=(nb,),
            in_specs=[pl.BlockSpec((S, TR), lambda j: (0, j)),
                      pl.BlockSpec((S, 1), lambda j: (0, 0)),
                      pl.BlockSpec((S, 1), lambda j: (0, 0))],
            out_specs=pl.BlockSpec((1, TR), lambda j: (0, j))),
        compiler_params=pltpu.CompilerParams(
            dimension_semantics=("parallel",),
            vmem_limit_bytes=plan["vmem_limit"]),
    )(obs_fm, w_lin, w_sq)


# --------------------------------------------------------------------------------------
# forward (fit + value), matching LinearFeatureBaseline.forward
# --------------------------------------------------------------------------------------
def linear_feature_baseline_forward(obs, reward_to_go, reg_coeff=1e-5,
                                    *, max_tile_rows=None, num_cores=None):
    """obs: (A0, A1, S); reward_to_go: any shape with A0*A1 elements -> (A0, A1) baseline."""
    obs = jnp.asarray(obs, jnp.float32)
    A0, A1, S = obs.shape
    plan = _plan(A0, A1, S, max_tile_rows=max_tile_rows, num_cores=num_cores)
    F, rows, rows_pad = plan["F"], plan["rows"], plan["rows_pad"]
    pad = rows_pad - rows

    # one-time feature-major relayout: flat row r = a1*A0 + a0 (torch featmat row order)
    obs_fm = jnp.pad(jnp.transpose(obs, (2, 1, 0)).reshape(S, rows), ((0, 0), (0, pad)))
    t1d = jnp.arange(A1, dtype=jnp.float32) / 100.0
    tv_fm = jnp.pad(jnp.stack([jnp.repeat(t1d, A0), jnp.ones((rows,), jnp.float32)], axis=0),
                    ((0, 0), (0, pad)))
    # NOTE: torch pairs featmat rows with reward_to_go.view(-1) in raw memory order.
    ret = jnp.asarray(reward_to_go, jnp.float32)
    assert ret.size == rows, (ret.shape, (A0, A1))
    ret_fm = jnp.pad(ret.reshape(1, rows), ((0, 0), (0, pad)))

    g = _gram(obs_fm, tv_fm, ret_fm, plan)             # (FP, FP)
    xtx = g[:F, :F]
    xty = g[:F, F]

    # torch.lstsq retry ladder: pick the first regularization level whose solve is finite.
    eye = jnp.eye(F, dtype=jnp.float32)
    regs = jnp.float32(reg_coeff) * (10.0 ** jnp.arange(5, dtype=jnp.float32))
    sols = jax.vmap(lambda r: jnp.linalg.solve(xtx + r * eye, xty))(regs)
    good = jnp.all(jnp.isfinite(sols), axis=1)
    w = sols[jnp.argmax(good)]
    # TODO(synk): torch raises if every regularization level fails; traced JAX cannot raise,
    # so a fully singular system yields NaNs instead.

    w_lin = w[0:S].reshape(S, 1)
    w_sq = w[S:2 * S].reshape(S, 1)
    v_obs = _values(obs_fm, w_lin, w_sq, plan)[0, :rows]            # (rows,)
    # time-feature contribution depends only on the timestep -> exact rank-1 term
    t_contrib = (w[2 * S] + (w[2 * S + 1] + w[2 * S + 2] * t1d) * t1d) * t1d + w[2 * S + 3]
    # value.view(A1, A0).transpose(0, 1) -> (A0, A1)
    return v_obs.reshape(A1, A0).T + t_contrib[None, :]


# --------------------------------------------------------------------------------------
# pure-JAX reference (mirrors the PyTorch code) for sanity checks
# --------------------------------------------------------------------------------------
def _reference_forward(obs, reward_to_go, reg_coeff=1e-5):
    obs = jnp.asarray(obs, jnp.float32)
    A0, A1, S = obs.shape
    F = 2 * S + 4
    o = jnp.transpose(obs, (1, 0, 2))
    ones = jnp.ones((A1, A0, 1), jnp.float32)
    t = jnp.arange(A1, dtype=jnp.float32).reshape(A1, 1, 1) * ones / 100.0
    X = jnp.concatenate([o, o * o, t, t ** 2, t ** 3, ones], axis=2).reshape(-1, F)
    y = jnp.asarray(reward_to_go, jnp.float32).reshape(-1, 1)
    xtx = jnp.matmul(X.T, X, precision=lax.Precision.HIGHEST)
    xty = jnp.matmul(X.T, y, precision=lax.Precision.HIGHEST)
    w = jnp.linalg.solve(xtx + reg_coeff * jnp.eye(F, dtype=jnp.float32), xty)
    return jnp.matmul(X, w, precision=lax.Precision.HIGHEST).reshape(A1, A0).T


if __name__ == "__main__":
    key = jax.random.PRNGKey(0)
    k1, k2, k3, k4 = jax.random.split(key, 4)

    # ---- test 1: module's documented shapes (single-tile fast path), end-to-end --------
    obs = jax.random.normal(k1, (8, 2, 4), dtype=jnp.float32)        # (A0, A1, n_state)
    rtg = jax.random.normal(k2, (2, 8), dtype=jnp.float32)           # A0*A1 returns
    out = jax.block_until_ready(linear_feature_baseline_forward(obs, rtg))
    ref = jax.block_until_ready(_reference_forward(obs, rtg))
    assert out.shape == (8, 2), out.shape
    assert bool(jnp.all(jnp.isfinite(out)))
    assert jnp.allclose(out, ref, atol=2e-2, rtol=2e-2), (out, ref)

    # ---- test 2: forced multi-block + row-padded + 2-core-partial reduction path -------
    obs2 = jax.random.normal(k3, (16, 203, 6), dtype=jnp.float32)
    rtg2 = jax.random.normal(k4, (16, 203), dtype=jnp.float32)
    out2 = jax.block_until_ready(
        linear_feature_baseline_forward(obs2, rtg2, max_tile_rows=512, num_cores=2))
    ref2 = jax.block_until_ready(_reference_forward(obs2, rtg2))
    assert out2.shape == (16, 203), out2.shape
    assert jnp.allclose(out2, ref2, atol=2e-2, rtol=2e-2), float(jnp.max(jnp.abs(out2 - ref2)))

    # ---- test 3: default hardware-derived plan on the same data ------------------------
    out3 = jax.block_until_ready(linear_feature_baseline_forward(obs2, rtg2))
    assert jnp.allclose(out3, ref2, atol=2e-2, rtol=2e-2)

    print("KERNEL_OK")
</pallas_src>

<mosaic_0001>
module attributes {stable_mosaic.version = 11 : i64} {
  func.func @kernel(%arg0: i32, %arg1: i32, %arg2: memref<4x128xf32, #tpu.memory_space<vmem>>, %arg3: memref<2x128xf32, #tpu.memory_space<vmem>>, %arg4: memref<1x128xf32, #tpu.memory_space<vmem>>, %arg5: memref<1x16x16xf32, #tpu.memory_space<vmem>>, %arg6: memref<16x128xf32, #tpu.memory_space<vmem>>) attributes {dimension_semantics = [#tpu.dimension_semantics<parallel>, #tpu.dimension_semantics<arbitrary>], iteration_bounds = array<i64: 1, 1>, scalar_prefetch = 0 : i64, scratch_operands = 1 : i64, tpu.core_type = #tpu.core_type<tc>, window_params = [{transform_indices = @transform_0, window_bounds = array<i64: 4, 128>}, {transform_indices = @transform_1, window_bounds = array<i64: 2, 128>}, {transform_indices = @transform_2, window_bounds = array<i64: 1, 128>}, {transform_indices = @transform_3, window_bounds = array<i64: 1, 16, 16>}]} {
    %c0_i32 = arith.constant 0 : i32
    %0 = arith.cmpi eq, %arg1, %c0_i32 : i32
    %1 = arith.extui %0 : i1 to i32
    %c0_i32_0 = arith.constant 0 : i32
    %2 = arith.cmpi ne, %1, %c0_i32_0 : i32
    scf.if %2 {
      %cst_22 = arith.constant 0.000000e+00 : f32
      %27 = vector.broadcast %cst_22 : f32 to vector<16x16xf32>
      %c0_23 = arith.constant 0 : index
      %c0_24 = arith.constant 0 : index
      %c0_25 = arith.constant 0 : index
      %28 = vector.load %arg5[%c0_23, %c0_24, %c0_25] : memref<1x16x16xf32, #tpu.memory_space<vmem>>, vector<1x16x16xf32>
      %29 = vector.shape_cast %28 : vector<1x16x16xf32> to vector<16x16xf32>
      %30 = vector.shape_cast %27 : vector<16x16xf32> to vector<1x16x16xf32>
      tpu.vector_store %arg5[%c0_23, %c0_24, %c0_25], %30 {strides = array<i32>} : memref<1x16x16xf32, #tpu.memory_space<vmem>>, vector<1x16x16xf32>,
      %cst_26 = arith.constant 0.000000e+00 : f32
      %31 = vector.broadcast %cst_26 : f32 to vector<16x128xf32>
      %c0_27 = arith.constant 0 : index
      %c0_28 = arith.constant 0 : index
      %32 = vector.load %arg6[%c0_27, %c0_28] : memref<16x128xf32, #tpu.memory_space<vmem>>, vector<16x128xf32>
      tpu.vector_store %arg6[%c0_27, %c0_28], %31 {strides = array<i32>} : memref<16x128xf32, #tpu.memory_space<vmem>>, vector<16x128xf32>,
    } else {
    }
    %c0 = arith.constant 0 : index
    %c0_1 = arith.constant 0 : index
    %3 = vector.load %arg2[%c0, %c0_1] : memref<4x128xf32, #tpu.memory_space<vmem>>, vector<4x128xf32>
    %c0_2 = arith.constant 0 : index
    %c0_3 = arith.constant 0 : index
    %4 = vector.load %arg3[%c0_2, %c0_3] : memref<2x128xf32, #tpu.memory_space<vmem>>, vector<2x128xf32>
    %5 = vector.extract_strided_slice %4 {offsets = [0, 0], sizes = [1, 128], strides = [1, 1]} : vector<2x128xf32> to vector<1x128xf32>
    %c0_4 = arith.constant 0 : index
    %c0_5 = arith.constant 0 : index
    %6 = vector.load %arg6[%c0_4, %c0_5] : memref<16x128xf32, #tpu.memory_space<vmem>>, vector<4x128xf32>
    tpu.vector_store %arg6[%c0_4, %c0_5], %3 {strides = array<i32>} : memref<16x128xf32, #tpu.memory_space<vmem>>, vector<4x128xf32>,
    %7 = arith.mulf %3, %3 : vector<4x128xf32>
    %c4 = arith.constant 4 : index
    %c0_6 = arith.constant 0 : index
    %8 = vector.load %arg6[%c4, %c0_6] : memref<16x128xf32, #tpu.memory_space<vmem>>, vector<4x128xf32>
    tpu.vector_store %arg6[%c4, %c0_6], %7 {strides = array<i32>} : memref<16x128xf32, #tpu.memory_space<vmem>>, vector<4x128xf32>,
    %c8 = arith.constant 8 : index
    %c0_7 = arith.constant 0 : index
    %9 = vector.load %arg6[%c8, %c0_7] : memref<16x128xf32, #tpu.memory_space<vmem>>, vector<1x128xf32>
    tpu.vector_store %arg6[%c8, %c0_7], %5 {strides = array<i32>} : memref<16x128xf32, #tpu.memory_space<vmem>>, vector<1x128xf32>,
    %10 = arith.mulf %5, %5 : vector<1x128xf32>
    %c9 = arith.constant 9 : index
    %c0_8 = arith.constant 0 : index
    %11 = vector.load %arg6[%c9, %c0_8] : memref<16x128xf32, #tpu.memory_space<vmem>>, vector<1x128xf32>
    tpu.vector_store %arg6[%c9, %c0_8], %10 {strides = array<i32>} : memref<16x128xf32, #tpu.memory_space<vmem>>, vector<1x128xf32>,
    %12 = arith.mulf %5, %5 : vector<1x128xf32>
    %13 = arith.mulf %12, %5 : vector<1x128xf32>
    %c10 = arith.constant 10 : index
    %c0_9 = arith.constant 0 : index
    %14 = vector.load %arg6[%c10, %c0_9] : memref<16x128xf32, #tpu.memory_space<vmem>>, vector<1x128xf32>
    tpu.vector_store %arg6[%c10, %c0_9], %13 {strides = array<i32>} : memref<16x128xf32, #tpu.memory_space<vmem>>, vector<1x128xf32>,
    %15 = vector.extract_strided_slice %4 {offsets = [1, 0], sizes = [1, 128], strides = [1, 1]} : vector<2x128xf32> to vector<1x128xf32>
    %c11 = arith.constant 11 : index
    %c0_10 = arith.constant 0 : index
    %16 = vector.load %arg6[%c11, %c0_10] : memref<16x128xf32, #tpu.memory_space<vmem>>, vector<1x128xf32>
    tpu.vector_store %arg6[%c11, %c0_10], %15 {strides = array<i32>} : memref<16x128xf32, #tpu.memory_space<vmem>>, vector<1x128xf32>,
    %c0_11 = arith.constant 0 : index
    %c0_12 = arith.constant 0 : index
    %17 = vector.load %arg4[%c0_11, %c0_12] : memref<1x128xf32, #tpu.memory_space<vmem>>, vector<1x128xf32>
    %c12 = arith.constant 12 : index
    %c0_13 = arith.constant 0 : index
    %18 = vector.load %arg6[%c12, %c0_13] : memref<16x128xf32, #tpu.memory_space<vmem>>, vector<1x128xf32>
    tpu.vector_store %arg6[%c12, %c0_13], %17 {strides = array<i32>} : memref<16x128xf32, #tpu.memory_space<vmem>>, vector<1x128xf32>,
    %c0_14 = arith.constant 0 : index
    %c0_15 = arith.constant 0 : index
    %19 = vector.load %arg6[%c0_14, %c0_15] : memref<16x128xf32, #tpu.memory_space<vmem>>, vector<16x128xf32>
    %c0_16 = arith.constant 0 : index
    %c0_17 = arith.constant 0 : index
    %c0_18 = arith.constant 0 : index
    %20 = vector.load %arg5[%c0_16, %c0_17, %c0_18] : memref<1x16x16xf32, #tpu.memory_space<vmem>>, vector<1x16x16xf32>
    %21 = vector.shape_cast %20 : vector<1x16x16xf32> to vector<16x16xf32>
    %cst = arith.constant dense<0.000000e+00> : vector<16x16xf32>
    %22 = tpu.matmul %19, %19, %cst {dimension_numbers = #tpu.dot_dimension_numbers<[1], [1], [0], [0], [0, 0, 1, 0], [], []>} : vector<16x128xf32>, vector<16x128xf32>, vector<16x16xf32> -> vector<16x16xf32>
    %23 = arith.addf %21, %22 : vector<16x16xf32>
    %c0_19 = arith.constant 0 : index
    %c0_20 = arith.constant 0 : index
    %c0_21 = arith.constant 0 : index
    %24 = vector.load %arg5[%c0_19, %c0_20, %c0_21] : memref<1x16x16xf32, #tpu.memory_space<vmem>>, vector<1x16x16xf32>
    %25 = vector.shape_cast %24 : vector<1x16x16xf32> to vector<16x16xf32>
    %26 = vector.shape_cast %23 : vector<16x16xf32> to vector<1x16x16xf32>
    tpu.vector_store %arg5[%c0_19, %c0_20, %c0_21], %26 {strides = array<i32>} : memref<1x16x16xf32, #tpu.memory_space<vmem>>, vector<1x16x16xf32>,
    return
  }
  func.func @transform_0(%arg0: i32, %arg1: i32) -> (i32, i32) {
    %c1_i32 = arith.constant 1 : i32
    %0 = arith.muli %arg0, %c1_i32 : i32
    %1 = arith.addi %0, %arg1 : i32
    %c0_i32 = arith.constant 0 : i32
    %c0_i32_0 = arith.constant 0 : i32
    return %c0_i32, %1 : i32, i32
  }
  func.func @transform_1(%arg0: i32, %arg1: i32) -> (i32, i32) {
    %c1_i32 = arith.constant 1 : i32
    %0 = arith.muli %arg0, %c1_i32 : i32
    %1 = arith.addi %0, %arg1 : i32
    %c0_i32 = arith.constant 0 : i32
    %c0_i32_0 = arith.constant 0 : i32
    return %c0_i32, %1 : i32, i32
  }
  func.func @transform_2(%arg0: i32, %arg1: i32) -> (i32, i32) {
    %c1_i32 = arith.constant 1 : i32
    %0 = arith.muli %arg0, %c1_i32 : i32
    %1 = arith.addi %0, %arg1 : i32
    %c0_i32 = arith.constant 0 : i32
    %c0_i32_0 = arith.constant 0 : i32
    return %c0_i32, %1 : i32, i32
  }
  func.func @transform_3(%arg0: i32, %arg1: i32) -> (i32, i32, i32) {
    %c0_i32 = arith.constant 0 : i32
    %c0_i32_0 = arith.constant 0 : i32
    %c0_i32_1 = arith.constant 0 : i32
    return %arg0, %c0_i32, %c0_i32_0 : i32, i32, i32
  }
}

</mosaic_0001>

<bundles_post_ra>
// kernel: tpu_custom_call.1
= control target key start
LH: loop header
LB: loop body
LE: loop exit
PB: predicated region body
PF: predicated region fallthrough
CT: control target
= control target key end

     0   :  { %8 = vsyncpa [#allocation4], 0  ;;  %s321_s0 = inlined_call_operand.hbm [shape: f32[4,128], index: 0, kind: input, shape index: {}]   ;;  %s322_s1 = inlined_call_operand.vmem [shape: f32[2,128], index: 1, kind: input, shape index: {}]   ;;  %s323_s2 = inlined_call_operand.vmem [shape: f32[1,128], index: 2, kind: input, shape index: {}]   ;;  %s324_s3 = inlined_call_operand.hbm [shape: f32[1,16,16], index: 3, kind: output, shape index: {}]  }
   0x1   :  { %9 = vsyncpa [#allocation5], 0  ;;  %s262_s12 = smov [#allocation3]   ;;  %s214_s16 = scalar_lea.hbm %s321_s0, 64 }
   0x2   :  { %s19_s13 = sshll.u32 %s262_s12, 4  ;;  %p215_p0 = scmp.ne.s32.totalorder %s321_s0, %s214_s16  ;;  %s20_s13 = int_to_ptr.vmem [resolvable:$true] %s19_s13 }
   0x3   :  { %p218_p1 = scmp.lt.u32.totalorder %s214_s16, %s321_s0 }
   0x5   :  { %p220_p2 = pnand %p218_p1, %p215_p0 }
   0x7   :  { %223 = shalt.err (!%p220_p2)
}
   0x8   :  { %s224_s21 = scalar_lea.vmem %s20_s13, 64  ;;  %p229_p4 = scmp.lt.s32.totalorder %s20_s13, %s20_s13 }
   0x9   :  { %p225_p3 = scmp.ne.s32.totalorder %s20_s13, %s224_s21  ;;  %p230_p5 = scmp.lt.s32.totalorder %s224_s21, %s224_s21 }
   0xb   :  { %p231_p6 = por %p230_p5, %p229_p4 }
   0xd   :  { %p232_p7 = pnand %p231_p6, %p225_p3 }
   0xf   :  { %235 = shalt.err (!%p232_p7)
}
  0x10   :  { %22 = dma.hbm_to_vmem [thread:$0]  %s321_s0, 64, %s20_s13, [#allocation4]  }
  0x11   :  { %258 = dma.done.wait [#allocation4], 64  }
  0x12   :  { %259 = vsyncadd [#allocation4], 4294967232  ;;  %vm66_vm0 = vcmask 130048   ;;  %v263_v0 = vmov 0.0   ;;  %v71_v1 = vld [vmem:[#allocation3] sm:$0xf] }
  0x13   :  { %69 = vst [vmem:[#allocation2] sm:$0xff] %v263_v0  ;;  %70 = vst [vmem:[#allocation2 + $0x8] sm:$0xff] %v263_v0  ;;  %v72_v2 = vld [vmem:[%s322_s1] sm:$0x3]  ;;  %v74_v4 = vmul.f32 %v71_v1, %v71_v1  ;;  %s264_s0 = smov [#allocation6]  }
  0x14   :  { %68 = vst.msk [vmem:[#allocation6 + $0x8] sm:$0xff] %vm66_vm0, %v263_v0  ;;  %67 = vst.msk [vmem:[#allocation6] sm:$0xff] %vm66_vm0, %v263_v0  ;;  %v82_v3 = vld [vmem:[%s323_s2] sm:$0x1]  ;;  %v77_v5 = vmul.f32 %v72_v2, %v72_v2  ;;  %s173_s1 = sshll.u32 %s264_s0, 4  ;;  %s174_s1 = int_to_ptr.vmem [resolvable:$true] %s173_s1 }
  0x15   :  { %73 = vst [vmem:[#allocation2] sm:$0xf] %v71_v1  ;;  %76 = vst [vmem:[#allocation2 + $0x8] sm:$0x1] %v72_v2  ;;  %s236_s2 = scalar_lea.vmem %s174_s1, 256  ;;  %p241_p9 = scmp.lt.s32.totalorder %s174_s1, %s174_s1 }
  0x16   :  { %81 = vst [vmem:[#allocation2 + $0xa] sm:$0x2] %v72_v2  ;;  %83 = vst [vmem:[#allocation2 + $0xc] sm:$0x1] %v82_v3  ;;  %v79_v6 = vmul.f32 %v77_v5, %v72_v2  ;;  %p237_p8 = scmp.ne.s32.totalorder %s174_s1, %s236_s2  ;;  %p242_p10 = scmp.lt.s32.totalorder %s236_s2, %s236_s2 }
  0x17   :  { %75 = vst [vmem:[#allocation2 + $0x4] sm:$0xf] %v74_v4  ;;  %78 = vst [vmem:[#allocation2 + $0x9] sm:$0x1] %v77_v5 }
  0x18   :  { %80 = vst [vmem:[#allocation2 + $0xa] sm:$0x1] %v79_v6  ;;  %p243_p11 = por %p242_p10, %p241_p9 }
  0x1a   :  { %p244_p12 = pnand %p243_p11, %p237_p8 }
  0x1b   :  { %v87_v10 = vld [vmem:[#allocation6 + $0x8] sm:$0xff]  ;;  %v86_v11 = vld [vmem:[#allocation6] sm:$0xff] }
  0x1e   :  { %v84_v7 = vld [vmem:[#allocation2] sm:$0xff] }
  0x1f   :  { %202 = vmatprep.mubr.f32.mxu0 %v84_v7  ;;  %v85_v8 = vld [vmem:[#allocation2 + $0x8] sm:$0xff] }
  0x20   :  { %v205_v9 = vpack.c.bf16 %v85_v8, %v84_v7 }
  0x22   :  { %206 = vmatprep.subr.bf16.mxu0 %v205_v9 }
  0x23   :  { %208 = vmatpush3.bf16.xpose.msra.mxu0 %v205_v9 }
  0x2a   :  { %203 = vmatmul.mubr.f32.vlgmr.msra.gmra.mrb[0].mxu0 %v85_v8 }
  0xfd   :  { %v204_v12 = vpop.f32.mrb[0].mxu0 }
  0xfe   :  { %v164_v13 = vadd.f32 %v204_v12, %v87_v10  ;;  %v154_v14 = vpop.f32.mrb[1].mxu0 }
  0xff   :  { %v163_v15 = vadd.f32 %v154_v14, %v86_v11 }
 0x100   :  { %167 = vst.msk [vmem:[#allocation6 + $0x8] sm:$0xff] %vm66_vm0, %v164_v13 }
 0x101   :  { %166 = vst.msk [vmem:[#allocation6] sm:$0xff] %vm66_vm0, %v163_v15 }
 0x102   :  { %247 = shalt.err (!%p244_p12)
}
 0x103   :  { %s248_s30 = scalar_lea.hbm %s324_s3, 256 }
 0x104   :  { %p249_p13 = scmp.ne.s32.totalorder %s324_s3, %s248_s30  ;;  %p252_p0 = scmp.lt.u32.totalorder %s248_s30, %s324_s3 }
 0x106   :  { %p254_p1 = pnand %p252_p0, %p249_p13 }
 0x108   :  { %257 = shalt.err (!%p254_p1)
}
 0x109   :  { %s265_s8 = smov 128   ;;  %s266_s9 = smov 8  }
 0x10a   :  { %179 = dma.vmem_to_hbm [thread:$0]  %s174_s1, 256, %s324_s3, [#allocation5], %s265_s8, %s265_s8, %s266_s9  }
 0x10b   :  { %260 = dma.done.wait [#allocation5], 256  }
 0x10c   :  { %261 = vsyncadd [#allocation5], 4294967040 }
 0x10d   :  { %183 = vsyncpa [#allocation4], 1 }
 0x10e   :  { %184 = vsyncpa [#allocation5], 1 }

</bundles_post_ra>
